<compile_context>
chip_gen: v5e
topology: v5e:2x2
jax: 0.10.0
libtpu: 0.0.40
codegen_flags: <defaults>
</compile_context>

<pallas_src>
import functools
import math

import jax
import jax.numpy as jnp
from jax.experimental import pallas as pl
from jax.experimental.pallas import tpu as pltpu


def _round_up(v, m):
    return (v + m - 1) // m * m


# --------------------------------------------------------------------------- #
# Phase 1: support = x @ W   (row-tiled, computed once, stored in bf16)
# --------------------------------------------------------------------------- #
def _support_kernel(x_ref, w_ref, s_ref):
    s = jnp.dot(x_ref[...], w_ref[...], preferred_element_type=jnp.float32)
    s_ref[...] = s.astype(s_ref.dtype)


def _support_matmul(x_p, w_p, *, tile_n, compute_dtype):
    n_pad, f_in_pad = x_p.shape
    f_out_pad = w_p.shape[1]
    grid_m = n_pad // tile_n

    itemsize = jnp.dtype(compute_dtype).itemsize
    est = (2 * tile_n * f_in_pad * itemsize        # double-buffered x tiles
           + f_in_pad * f_out_pad * itemsize       # resident weight
           + 2 * tile_n * f_out_pad * itemsize)    # double-buffered out tiles
    vmem_limit = min(max(int(est * 2) + (4 << 20), 16 << 20), 48 << 20)

    return pl.pallas_call(
        _support_kernel,
        out_shape=jax.ShapeDtypeStruct((n_pad, f_out_pad), compute_dtype),
        grid_spec=pltpu.PrefetchScalarGridSpec(
            num_scalar_prefetch=0,
            grid=(grid_m,),
            in_specs=[
                pl.BlockSpec((tile_n, f_in_pad), lambda i: (i, 0)),
                pl.BlockSpec((f_in_pad, f_out_pad), lambda i: (0, 0)),
            ],
            out_specs=pl.BlockSpec((tile_n, f_out_pad), lambda i: (i, 0)),
        ),
        compiler_params=pltpu.CompilerParams(
            dimension_semantics=("parallel",),
            vmem_limit_bytes=vmem_limit,
        ),
    )(x_p, w_p)


# --------------------------------------------------------------------------- #
# Phase 2: out = adj @ support + b   (tiled reduction with f32 accumulator)
# --------------------------------------------------------------------------- #
def _aggregate_kernel(adj_ref, s_ref, b_ref, out_ref, acc_ref, *, apply_relu):
    k = pl.program_id(1)

    @pl.when(k == 0)
    def _init():
        acc_ref[...] = jnp.zeros_like(acc_ref)

    acc_ref[...] += jnp.dot(adj_ref[...], s_ref[...],
                            preferred_element_type=jnp.float32)

    @pl.when(k == pl.num_programs(1) - 1)
    def _finalize():
        out = acc_ref[...] + b_ref[...]        # bias only in the epilogue
        if apply_relu:                         # optional hook; off for the module
            out = jnp.maximum(out, 0.0)
        out_ref[...] = out.astype(out_ref.dtype)


def _aggregate_matmul(adj_p, s_p, b_p, *, tile_n, apply_relu):
    n_pad = adj_p.shape[0]
    f_out_pad = s_p.shape[1]
    grid_m = n_pad // tile_n
    grid_k = n_pad // tile_n

    itemsize = adj_p.dtype.itemsize
    est = (2 * tile_n * tile_n * itemsize          # double-buffered adj tiles
           + 2 * tile_n * f_out_pad * itemsize     # double-buffered support tiles
           + 2 * tile_n * f_out_pad * 4            # double-buffered out tiles (f32)
           + tile_n * f_out_pad * 4                # f32 accumulator scratch
           + 2 * f_out_pad * 4)                    # bias
    vmem_limit = min(max(int(est * 2) + (4 << 20), 16 << 20), 48 << 20)

    kernel = functools.partial(_aggregate_kernel, apply_relu=apply_relu)
    return pl.pallas_call(
        kernel,
        out_shape=jax.ShapeDtypeStruct((n_pad, f_out_pad), jnp.float32),
        grid_spec=pltpu.PrefetchScalarGridSpec(
            num_scalar_prefetch=0,
            grid=(grid_m, grid_k),
            in_specs=[
                pl.BlockSpec((tile_n, tile_n), lambda i, k: (i, k)),       # adj
                pl.BlockSpec((tile_n, f_out_pad), lambda i, k: (k, 0)),    # support
                pl.BlockSpec((1, f_out_pad), lambda i, k: (0, 0)),         # bias
            ],
            out_specs=pl.BlockSpec((tile_n, f_out_pad), lambda i, k: (i, 0)),
            scratch_shapes=[pltpu.VMEM((tile_n, f_out_pad), jnp.float32)],
        ),
        compiler_params=pltpu.CompilerParams(
            # Row tiles independent -> parallel (2 TCs on v7x); reduction axis
            # last and arbitrary.
            dimension_semantics=("parallel", "arbitrary"),
            vmem_limit_bytes=vmem_limit,
        ),
    )(adj_p, s_p, b_p)


# --------------------------------------------------------------------------- #
# Public forward: GraphConvolution.forward(input1, adj)
# --------------------------------------------------------------------------- #
def graph_convolution(x, adj, weight, bias=None, *, apply_relu=False,
                      tile_n=256, compute_dtype=jnp.bfloat16):
    """out = adj @ (x @ weight) + bias, matching the PyTorch module forward."""
    n, f_in = x.shape
    f_out = weight.shape[1]
    assert adj.shape == (n, n)

    lane = 128
    n_pad = _round_up(n, tile_n)
    f_in_pad = _round_up(f_in, lane)
    f_out_pad = _round_up(f_out, lane)

    # Zero padding is neutral for both matmuls; padded rows/cols are sliced off.
    x_p = jnp.zeros((n_pad, f_in_pad), compute_dtype).at[:n, :f_in].set(
        x.astype(compute_dtype))
    adj_p = jnp.zeros((n_pad, n_pad), compute_dtype).at[:n, :n].set(
        adj.astype(compute_dtype))
    w_p = jnp.zeros((f_in_pad, f_out_pad), compute_dtype).at[:f_in, :f_out].set(
        weight.astype(compute_dtype))
    if bias is None:
        b_p = jnp.zeros((1, f_out_pad), jnp.float32)
    else:
        b_p = jnp.zeros((1, f_out_pad), jnp.float32).at[0, :f_out].set(
            bias.astype(jnp.float32).reshape(-1))

    support = _support_matmul(x_p, w_p, tile_n=tile_n,
                              compute_dtype=compute_dtype)
    out_p = _aggregate_matmul(adj_p, support, b_p, tile_n=tile_n,
                              apply_relu=apply_relu)
    return out_p[:n, :f_out]


if __name__ == "__main__":
    # Small synthetic graph: 300 nodes, 48 input features, 8 output classes.
    # Padded internally to N_pad=512, F_in_pad=128, F_out_pad=128 -> 2x2 grid.
    N, F_IN, F_OUT = 300, 48, 8

    key = jax.random.PRNGKey(0)
    kx, ka, kw, kb = jax.random.split(key, 4)

    x = jax.random.normal(kx, (N, F_IN), jnp.float32)

    # Symmetric, row-normalized adjacency with self-loops (typical GCN input).
    a = (jax.random.uniform(ka, (N, N)) > 0.7).astype(jnp.float32)
    a = jnp.maximum(a, a.T) + jnp.eye(N, dtype=jnp.float32)
    adj = a / jnp.sum(a, axis=1, keepdims=True)

    # Mimic reset_parameters(stdv): uniform(-stdv, stdv) for weight and bias.
    stdv = 1.0 / math.sqrt(F_OUT)
    w = jax.random.uniform(kw, (F_IN, F_OUT), jnp.float32, -stdv, stdv)
    b = jax.random.uniform(kb, (F_OUT,), jnp.float32, -stdv, stdv)

    out = graph_convolution(x, adj, w, b)
    jax.block_until_ready(out)
    assert out.shape == (N, F_OUT)

    # Tight reference replicating the kernel's bf16-input / f32-accumulate math.
    x_c = x.astype(jnp.bfloat16).astype(jnp.float32)
    w_c = w.astype(jnp.bfloat16).astype(jnp.float32)
    a_c = adj.astype(jnp.bfloat16).astype(jnp.float32)
    sup = (x_c @ w_c).astype(jnp.bfloat16).astype(jnp.float32)
    ref = a_c @ sup + b[None, :]
    assert jnp.allclose(out, ref, atol=1e-3, rtol=1e-3), float(
        jnp.max(jnp.abs(out - ref)))

    # Loose sanity check against the full-precision module math.
    ref_f32 = adj @ (x @ w) + b[None, :]
    assert jnp.allclose(out, ref_f32, atol=5e-2, rtol=5e-2), float(
        jnp.max(jnp.abs(out - ref_f32)))

    print("KERNEL_OK")
</pallas_src>

<mosaic_0001>
module attributes {stable_mosaic.version = 11 : i64} {
  func.func @_support_kernel(%arg0: i32, %arg1: memref<256x128xbf16, #tpu.memory_space<vmem>>, %arg2: memref<128x128xbf16, #tpu.memory_space<vmem>>, %arg3: memref<256x128xbf16, #tpu.memory_space<vmem>>) attributes {dimension_semantics = [#tpu.dimension_semantics<parallel>], iteration_bounds = array<i64: 2>, scalar_prefetch = 0 : i64, scratch_operands = 0 : i64, tpu.core_type = #tpu.core_type<tc>, window_params = [{transform_indices = @transform_0, window_bounds = array<i64: 256, 128>}, {pipeline_mode = #tpu.pipeline_mode<synchronous>, transform_indices = @transform_1, window_bounds = array<i64: 128, 128>}, {transform_indices = @transform_2, window_bounds = array<i64: 256, 128>}]} {
    %c0 = arith.constant 0 : index
    %c0_0 = arith.constant 0 : index
    %0 = vector.load %arg1[%c0, %c0_0] : memref<256x128xbf16, #tpu.memory_space<vmem>>, vector<256x128xbf16>
    %c0_1 = arith.constant 0 : index
    %c0_2 = arith.constant 0 : index
    %1 = vector.load %arg2[%c0_1, %c0_2] : memref<128x128xbf16, #tpu.memory_space<vmem>>, vector<128x128xbf16>
    %cst = arith.constant dense<0.000000e+00> : vector<256x128xf32>
    %2 = tpu.matmul %0, %1, %cst {dimension_numbers = #tpu.dot_dimension_numbers<[1], [0], [0], [1], [0, 0, 1, 1], [], []>} : vector<256x128xbf16>, vector<128x128xbf16>, vector<256x128xf32> -> vector<256x128xf32>
    %3 = arith.truncf %2 : vector<256x128xf32> to vector<256x128xbf16>
    %c0_3 = arith.constant 0 : index
    %c0_4 = arith.constant 0 : index
    %4 = vector.load %arg3[%c0_3, %c0_4] : memref<256x128xbf16, #tpu.memory_space<vmem>>, vector<256x128xbf16>
    tpu.vector_store %arg3[%c0_3, %c0_4], %3 {strides = array<i32>} : memref<256x128xbf16, #tpu.memory_space<vmem>>, vector<256x128xbf16>,
    return
  }
  func.func @transform_0(%arg0: i32) -> (i32, i32) {
    %c0_i32 = arith.constant 0 : i32
    %c0_i32_0 = arith.constant 0 : i32
    return %arg0, %c0_i32 : i32, i32
  }
  func.func @transform_1(%arg0: i32) -> (i32, i32) {
    %c0_i32 = arith.constant 0 : i32
    %c0_i32_0 = arith.constant 0 : i32
    %c0_i32_1 = arith.constant 0 : i32
    return %c0_i32, %c0_i32_0 : i32, i32
  }
  func.func @transform_2(%arg0: i32) -> (i32, i32) {
    %c0_i32 = arith.constant 0 : i32
    %c0_i32_0 = arith.constant 0 : i32
    return %arg0, %c0_i32 : i32, i32
  }
}

</mosaic_0001>

<bundles_post_ra>
// kernel: tpu_custom_call.1
= control target key start
LH: loop header
LB: loop body
LE: loop exit
PB: predicated region body
PF: predicated region fallthrough
CT: control target
= control target key end

     0   :  { %7 = vsyncpa [#allocation3], 0  ;;  %s1282_s0 = inlined_call_operand.hbm [shape: bf16[512,128], index: 0, kind: input, shape index: {}]   ;;  %s1283_s1 = inlined_call_operand.hbm [shape: bf16[128,128], index: 1, kind: input, shape index: {}]   ;;  %s1284_s2 = inlined_call_operand.hbm [shape: bf16[512,128], index: 2, kind: output, shape index: {}]  }
   0x1   :  { %9 = vsyncpa [#allocation3 + $0x1], 0 }
   0x2   :  { %10 = vsyncpa [#allocation6], 0 }
   0x3   :  { %11 = vsyncpa [#allocation4], 0 }
   0x4   :  { %13 = vsyncpa [#allocation4 + $0x1], 0  ;;  %s1097_s9 = smov 0   ;;  %s1099_s10 = smov 0  }
   0x5   :  { %s1101_s11 = smov 0   ;;  %s1103_s12 = smov 0  }
   0x6 LB: > { %s1118_s13 = sadd.s32 4294967295, %s1075_s12   ;;  %s627_s14 = sadd.s32 4294967294, %s1075_s12   ;;  %s1075_s12 = sphi %s1103_s12, %s1294_s12   ;;  %s1071_s11 = sphi %s1101_s11, %s1293_s11   ;;  %s1067_s10 = sphi %s1099_s10, %s1292_s10   ;;  %s1063_s9 = sphi %s1097_s9, %s1291_s9  }
   0x7   : > { %p39_p0 = scmp.ne.s32.totalorder %s1067_s10, %s1063_s9  ;;  %p40_p1 = scmp.eq.s32.totalorder %s1118_s13, 0 }
   0x8   : > { %p84_p2 = scmp.eq.s32.totalorder %s1118_s13, 1  ;;  %p90_p3 = scmp.eq.s32.totalorder %s627_s14, 1 }
   0x9   : > { %p1127_p4 = por %p40_p1, %p39_p0  ;;  %p628_p5 = scmp.ge.s32.totalorder %s1075_s12, 1 }
   0xa   : > { %p1132_p6 = por %p90_p3, %p39_p0  ;;  %p97_p7 = scmp.lt.s32.totalorder %s1075_s12, 3 }
   0xb   : > { %s108_s19 = sshll.u32 %s1283_s1, 4  ;;  %s1077_s21 = smov [#allocation5]   ;;  %s109_s19 = int_to_ptr.hbm [resolvable:$true] %s108_s19 }
   0xc   : > { %p1140_p8 = pnand %p628_p5, %p97_p7  ;;  %s110_s22 = sshll.u32 %s1077_s21, 4  ;;  %s111_s22 = int_to_ptr.vmem [resolvable:$true] %s110_s22 }
   0xd   : > { %s1150_s23 = sadd.s32 1, %s1075_s12   ;;  %s1078_s24 = smov 64  }
   0xe   : > { %p892_p9 = pneg %p1140_p8  ;;  %s1079_s25 = smov 4  }
   0xf   : > { %s23_s26 = ssub.s32 %s1075_s12, %s1150_s23  ;;  %s26_s27 = sadd.s32 1, %s1071_s11 }
  0x10   : > { %p893_p10 = pnand %p892_p9, %p40_p1  ;;  %p24_p12 = scmp.eq.s32.totalorder %s23_s26, 0 }
  0x11   : > { %p33_p13 = scmp.ne.s32.totalorder %s1071_s11, %s1067_s10  ;;  %p34_p0 = scmp.eq.s32.totalorder %s1075_s12, 0 }
  0x12   : > { %895 = dma.hbm_to_vmem [thread:$0]  (!%p893_p10), %s109_s19, 1024, %s111_s22, [#allocation6], %s1078_s24, %s1078_s24, %s1079_s25  }
  0x13   : > { %s1162_s28 = scalar_select %p24_p12, %s1071_s11, %s26_s27  }
  0x14   : > { %p1166_p3 = por %p84_p2, %p33_p13  ;;  %p905_p5 = scmp.lt.s32.totalorder %s1075_s12, 2 }
  0x15   : > { %s124_s30 = sand.u32 1, %s1071_s11   ;;  %s739_s3 = sshll.u32 %s1075_s12, 7 }
  0x16   : > { %p35_p7 = por %p34_p0, %p33_p13  ;;  %s631_s4 = sshll.u32 %s124_s30, 7 }
  0x17   : > { %s133_s7 = scalar_lea.hbm %s1282_s0, %s739_s3  ;;  %s128_s14 = scalar_lea.vmem [#allocation2], %s631_s4 }
  0x18   : > { %s134_s8 = sshll.u32 %s133_s7, 4  ;;  %s136_s17 = sshll.u32 %s128_s14, 4  ;;  %s135_s8 = int_to_ptr.hbm [resolvable:$true] %s134_s8  ;;  %s137_s17 = int_to_ptr.vmem [resolvable:$true] %s136_s17 }
  0x19   : > { %p1176_p9 = pnand %p905_p5, %p35_p7  ;;  %s125_s19 = scalar_lea.sflag [#allocation3], %s124_s30 }
  0x1a   : > { %s975_s21 = sshra.s32 %s135_s8, 4  ;;  %s982_s3 = scalar_lea.hbm %s1282_s0, 256  ;;  %s976_s21 = int_to_ptr.hbm [resolvable:$true] %s975_s21 }
  0x1b   : > { %s977_s22 = scalar_lea.hbm %s976_s21, 128  ;;  %p979_p10 = pneg %p1176_p9 }
  0x1c   : > { %p978_p2 = scmp.ne.s32.totalorder %s976_s21, %s977_s22  ;;  %p983_p0 = scmp.lt.s32.totalorder %s976_s21, %s1282_s0 }
  0x1d   : > { %p984_p5 = scmp.lt.s32.totalorder %s982_s3, %s977_s22 }
  0x1e   : > { %p980_p12 = pnand %p979_p10, %p978_p2 }
  0x1f   : > { %p985_p7 = por %p984_p5, %p983_p0 }
  0x20   : > { %p981_p13 = pneg %p980_p12 }
  0x22   : > { %p986_p11 = pnand %p985_p7, %p981_p13 }
  0x24   : > { %989 = shalt.err (!%p986_p11)
}
  0x25   : > { %899 = dma.hbm_to_vmem [thread:$0]  (!%p1176_p9), %s135_s8, 2048, %s137_s17, %s125_s19, %s1078_s24, %s1078_s24, %s1079_s25  }
  0x26   : > { %148 = sbr.rel (%p1140_p8) target bundleno = 274 (0x112), region = 28  ;;  %s1196_s30 = sand.u32 (!%p1140_p8), 1, %s1067_s10  }
  0x27   : > { %s635_s6 = sshll.u32 (!%p1140_p8), %s1196_s30, 7  ;;  %s151_s7 = scalar_lea.sflag (!%p1140_p8), [#allocation3], %s1196_s30 }
  0x28   : > { %s1202_s14 = scalar_lea.vmem (!%p1140_p8), [#allocation2], %s635_s6 }
  0x2b   : > { %1050 = dma.done.wait (%p1127_p4), %s151_s7, 2048  }
  0x2c   : > { %1052 = vsyncadd (%p1127_p4), %s151_s7, 4294965248 }
  0x2d   : > { %1054 = dma.done.wait (%p40_p1), [#allocation6], 1024  }
  0x2e   : > { %1056 = vsyncadd (%p40_p1), [#allocation6], 4294966272  ;;  %v763_v0 = vld [vmem:[#allocation5 + $0x38] sm:$0xff]  ;;  %v762_v1 = vld [vmem:[#allocation5 + $0x30] sm:$0xff]  ;;  %s1230_s15 = scalar_lea.vmem [#allocation7], %s635_s6  ;;  %s764_s20 = sshll.u32 %s1118_s13, 7 }
  0x2f   : > { %375 = vmatpush.bf16.msra.mxu0 %v763_v0  ;;  %860 = vmatpush.bf16.msra.mxu1 %v763_v0  ;;  %v761_v2 = vld [vmem:[#allocation5 + $0x28] sm:$0xff]  ;;  %v760_v3 = vld [vmem:[#allocation5 + $0x20] sm:$0xff]  ;;  %v759_v4 = vld [vmem:[#allocation5 + $0x18] sm:$0xff]  ;;  %s540_s8 = scalar_lea.hbm %s1284_s2, %s764_s20  ;;  %s541_s17 = sshll.u32 %s1230_s15, 4  ;;  %s542_s17 = int_to_ptr.vmem [resolvable:$true] %s541_s17 }
  0x30   : > { %861 = vmatpush.bf16.msra.mxu2 %v763_v0  ;;  %862 = vmatpush.bf16.msra.mxu3 %v763_v0  ;;  %v758_v5 = vld [vmem:[#allocation5 + $0x10] sm:$0xff]  ;;  %v757_v6 = vld [vmem:[#allocation5 + $0x8] sm:$0xff]  ;;  %v756_v7 = vld [vmem:[#allocation5] sm:$0xff]  ;;  %s543_s18 = sshll.u32 %s540_s8, 4  ;;  %s529_s13 = scalar_lea.sflag [#allocation4], %s1196_s30  ;;  %s544_s18 = int_to_ptr.hbm [resolvable:$true] %s543_s18 }
  0x31   : > { %v740_v8 = vld [vmem:[%s1202_s14] sm:$0xff]  ;;  %v741_v12 = vld [vmem:[%s1202_s14 + $0x8] sm:$0xff]  ;;  %v742_v16 = vld [vmem:[%s1202_s14 + $0x10] sm:$0xff]  ;;  %s1019_s19 = sshra.s32 %s544_s18, 4  ;;  %s1025_s27 = scalar_lea.hbm %s1284_s2, 256  ;;  %s1020_s19 = int_to_ptr.hbm [resolvable:$true] %s1019_s19 }
  0x32   : > { %v744_v9 = vld [vmem:[%s1202_s14 + $0x20] sm:$0xff]  ;;  %v745_v13 = vld [vmem:[%s1202_s14 + $0x28] sm:$0xff]  ;;  %v746_v17 = vld [vmem:[%s1202_s14 + $0x30] sm:$0xff]  ;;  %s1021_s21 = scalar_lea.hbm %s1020_s19, 128  ;;  %p1026_p11 = scmp.lt.s32.totalorder %s1020_s19, %s1284_s2 }
  0x33   : > { %376 = vmatpush.bf16.msra.mxu0 %v762_v1  ;;  %863 = vmatpush.bf16.msra.mxu1 %v762_v1  ;;  %v748_v10 = vld [vmem:[%s1202_s14 + $0x40] sm:$0xff]  ;;  %v749_v14 = vld [vmem:[%s1202_s14 + $0x48] sm:$0xff]  ;;  %v750_v18 = vld [vmem:[%s1202_s14 + $0x50] sm:$0xff]  ;;  %p1022_p1 = scmp.ne.s32.totalorder %s1020_s19, %s1021_s21  ;;  %p1027_p9 = scmp.lt.s32.totalorder %s1025_s27, %s1021_s21 }
  0x34   : > { %864 = vmatpush.bf16.msra.mxu2 %v762_v1  ;;  %865 = vmatpush.bf16.msra.mxu3 %v762_v1  ;;  %v752_v11 = vld [vmem:[%s1202_s14 + $0x60] sm:$0xff]  ;;  %v753_v15 = vld [vmem:[%s1202_s14 + $0x68] sm:$0xff]  ;;  %v754_v19 = vld [vmem:[%s1202_s14 + $0x70] sm:$0xff] }
  0x35   : > { %v743_v20 = vld [vmem:[%s1202_s14 + $0x18] sm:$0xff]  ;;  %p1023_p4 = pnand %p1022_p1, %p1166_p3  ;;  %p1028_p2 = por %p1027_p9, %p1026_p11 }
  0x36   : > { %v747_v21 = vld [vmem:[%s1202_s14 + $0x38] sm:$0xff] }
  0x37   : > { %377 = vmatpush.bf16.msra.mxu0 %v761_v2  ;;  %866 = vmatpush.bf16.msra.mxu1 %v761_v2  ;;  %v751_v22 = vld [vmem:[%s1202_s14 + $0x58] sm:$0xff]  ;;  %p1024_p8 = pneg %p1023_p4 }
  0x38   : > { %867 = vmatpush.bf16.msra.mxu2 %v761_v2  ;;  %868 = vmatpush.bf16.msra.mxu3 %v761_v2  ;;  %v755_v23 = vld [vmem:[%s1202_s14 + $0x78] sm:$0xff] }
  0x39   : > { %p1029_p10 = pnand %p1028_p2, %p1024_p8 }
  0x3b   : > { %378 = vmatpush.bf16.msra.mxu0 %v760_v3  ;;  %869 = vmatpush.bf16.msra.mxu1 %v760_v3 }
  0x3c   : > { %870 = vmatpush.bf16.msra.mxu2 %v760_v3  ;;  %871 = vmatpush.bf16.msra.mxu3 %v760_v3 }
  0x3f   : > { %379 = vmatpush.bf16.msra.mxu0 %v759_v4  ;;  %872 = vmatpush.bf16.msra.mxu1 %v759_v4 }
  0x40   : > { %873 = vmatpush.bf16.msra.mxu2 %v759_v4  ;;  %874 = vmatpush.bf16.msra.mxu3 %v759_v4 }
  0x43   : > { %380 = vmatpush.bf16.msra.mxu0 %v758_v5  ;;  %875 = vmatpush.bf16.msra.mxu1 %v758_v5 }
  0x44   : > { %876 = vmatpush.bf16.msra.mxu2 %v758_v5  ;;  %877 = vmatpush.bf16.msra.mxu3 %v758_v5 }
  0x47   : > { %381 = vmatpush.bf16.msra.mxu0 %v757_v6  ;;  %878 = vmatpush.bf16.msra.mxu1 %v757_v6 }
  0x48   : > { %879 = vmatpush.bf16.msra.mxu2 %v757_v6  ;;  %880 = vmatpush.bf16.msra.mxu3 %v757_v6 }
  0x4b   : > { %382 = vmatpush.bf16.msra.mxu0 %v756_v7  ;;  %881 = vmatpush.bf16.msra.mxu1 %v756_v7 }
  0x4c   : > { %882 = vmatpush.bf16.msra.mxu2 %v756_v7  ;;  %883 = vmatpush.bf16.msra.mxu3 %v756_v7 }
  0x4e   : > { %383 = vmatmul.bf16.vlgmr.msra.gmra.mxu0 %v740_v8  ;;  %403 = vmatmul.bf16.vlgmr.msra.gmra.mxu1 %v744_v9 }
  0x4f   : > { %423 = vmatmul.bf16.vlgmr.msra.gmra.mxu2 %v748_v10  ;;  %443 = vmatmul.bf16.vlgmr.msra.gmra.mxu3 %v752_v11 }
  0x5e   : > { %388 = vmatmul.bf16.gmra.mxu0 %v741_v12  ;;  %408 = vmatmul.bf16.gmra.mxu1 %v745_v13 }
  0x5f   : > { %428 = vmatmul.bf16.gmra.mxu2 %v749_v14  ;;  %448 = vmatmul.bf16.gmra.mxu3 %v753_v15 }
  0x6e   : > { %393 = vmatmul.bf16.gmra.mxu0 %v742_v16  ;;  %413 = vmatmul.bf16.gmra.mxu1 %v746_v17 }
  0x6f   : > { %433 = vmatmul.bf16.gmra.mxu2 %v750_v18  ;;  %453 = vmatmul.bf16.gmra.mxu3 %v754_v19 }
  0x7e   : > { %398 = vmatmul.bf16.gmra.mxu0 %v743_v20  ;;  %418 = vmatmul.bf16.gmra.mxu1 %v747_v21 }
  0x7f   : > { %438 = vmatmul.bf16.gmra.mxu2 %v751_v22  ;;  %458 = vmatmul.bf16.gmra.mxu3 %v755_v23 }
  0xcb   : > { %v384_v24 = vpop.f32.mrf.mxu0  ;;  %v404_v25 = vpop.f32.mrf.mxu1 }
  0xd2   : > { %v424_v26 = vpop.f32.mrf.mxu2  ;;  %v444_v27 = vpop.f32.mrf.mxu3 }
  0xd3   : > { %v386_v28 = vpop.f32.mrf.mxu0  ;;  %v406_v29 = vpop.f32.mrf.mxu1 }
  0xd4   : > { %v768_v30 = vpack.c.bf16 %v386_v28, %v384_v24  ;;  %v788_v31 = vpack.c.bf16 %v406_v29, %v404_v25 }
  0xd6   : > { %769 = vst [vmem:[%s1230_s15] sm:$0xff] %v768_v30  }
  0xd7   : > { %848 = vst [vmem:[%s1230_s15 + $0x20] sm:$0xff] %v788_v31  }
  0xda   : > { %v426_v32 = vpop.f32.mrf.mxu2  ;;  %v446_v33 = vpop.f32.mrf.mxu3 }
  0xdb   : > { %v808_v34 = vpack.c.bf16 %v426_v32, %v424_v26  ;;  %v828_v35 = vpack.c.bf16 %v446_v33, %v444_v27  ;;  %v389_v36 = vpop.f32.mrf.mxu0  ;;  %v409_v37 = vpop.f32.mrf.mxu1 }
  0xdd   : > { %852 = vst [vmem:[%s1230_s15 + $0x40] sm:$0xff] %v808_v34  }
  0xde   : > { %856 = vst [vmem:[%s1230_s15 + $0x60] sm:$0xff] %v828_v35  }
  0xe2   : > { %v429_v38 = vpop.f32.mrf.mxu2  ;;  %v449_v39 = vpop.f32.mrf.mxu3 }
  0xe3   : > { %v391_v40 = vpop.f32.mrf.mxu0  ;;  %v411_v41 = vpop.f32.mrf.mxu1 }
  0xe4   : > { %v773_v42 = vpack.c.bf16 %v391_v40, %v389_v36  ;;  %v793_v43 = vpack.c.bf16 %v411_v41, %v409_v37 }
  0xe6   : > { %845 = vst [vmem:[%s1230_s15 + $0x8] sm:$0xff] %v773_v42  }
  0xe7   : > { %849 = vst [vmem:[%s1230_s15 + $0x28] sm:$0xff] %v793_v43  }
  0xea   : > { %v431_v44 = vpop.f32.mrf.mxu2  ;;  %v451_v45 = vpop.f32.mrf.mxu3 }
  0xeb   : > { %v813_v46 = vpack.c.bf16 %v431_v44, %v429_v38  ;;  %v833_v47 = vpack.c.bf16 %v451_v45, %v449_v39  ;;  %v394_v48 = vpop.f32.mrf.mxu0  ;;  %v414_v49 = vpop.f32.mrf.mxu1 }
  0xed   : > { %853 = vst [vmem:[%s1230_s15 + $0x48] sm:$0xff] %v813_v46  }
  0xee   : > { %857 = vst [vmem:[%s1230_s15 + $0x68] sm:$0xff] %v833_v47  }
  0xf2   : > { %v434_v50 = vpop.f32.mrf.mxu2  ;;  %v454_v51 = vpop.f32.mrf.mxu3 }
  0xf3   : > { %v396_v52 = vpop.f32.mrf.mxu0  ;;  %v416_v53 = vpop.f32.mrf.mxu1 }
  0xf4   : > { %v778_v54 = vpack.c.bf16 %v396_v52, %v394_v48  ;;  %v798_v55 = vpack.c.bf16 %v416_v53, %v414_v49 }
  0xf6   : > { %846 = vst [vmem:[%s1230_s15 + $0x10] sm:$0xff] %v778_v54  }
  0xf7   : > { %850 = vst [vmem:[%s1230_s15 + $0x30] sm:$0xff] %v798_v55  }
  0xfa   : > { %v436_v56 = vpop.f32.mrf.mxu2  ;;  %v456_v57 = vpop.f32.mrf.mxu3 }
  0xfb   : > { %v818_v58 = vpack.c.bf16 %v436_v56, %v434_v50  ;;  %v838_v59 = vpack.c.bf16 %v456_v57, %v454_v51  ;;  %v399_v60 = vpop.f32.mrf.mxu0  ;;  %v419_v61 = vpop.f32.mrf.mxu1 }
  0xfd   : > { %854 = vst [vmem:[%s1230_s15 + $0x50] sm:$0xff] %v818_v58  }
  0xfe   : > { %858 = vst [vmem:[%s1230_s15 + $0x70] sm:$0xff] %v838_v59  }
 0x102   : > { %v439_v62 = vpop.f32.mrf.mxu2  ;;  %v459_v63 = vpop.f32.mrf.mxu3 }
 0x103   : > { %v401_v0 = vpop.f32.mrf.mxu0  ;;  %v421_v1 = vpop.f32.mrf.mxu1 }
 0x104   : > { %v783_v2 = vpack.c.bf16 %v401_v0, %v399_v60  ;;  %v803_v3 = vpack.c.bf16 %v421_v1, %v419_v61 }
 0x106   : > { %847 = vst [vmem:[%s1230_s15 + $0x18] sm:$0xff] %v783_v2  }
 0x107   : > { %851 = vst [vmem:[%s1230_s15 + $0x38] sm:$0xff] %v803_v3  }
 0x10a   : > { %v441_v4 = vpop.f32.mrf.mxu2  ;;  %v461_v5 = vpop.f32.mrf.mxu3 }
 0x10b   : > { %v823_v6 = vpack.c.bf16 %v441_v4, %v439_v62  ;;  %v843_v7 = vpack.c.bf16 %v461_v5, %v459_v63 }
 0x10d   : > { %855 = vst [vmem:[%s1230_s15 + $0x58] sm:$0xff] %v823_v6  }
 0x10e   : > { %859 = vst [vmem:[%s1230_s15 + $0x78] sm:$0xff] %v843_v7  }
 0x10f   : > { %1032 = shalt.err (!%p1029_p10)
}
 0x110   : > { %s1080_s5 = smov 64   ;;  %s1081_s30 = smov 4  }
 0x111   : > { %890 = dma.vmem_to_hbm [thread:$0]  (%p1166_p3), %s542_s17, 2048, %s544_s18, %s529_s13, %s1080_s5, %s1080_s5, %s1081_s30  }
 0x112 PF: > { %s558_s6 = sand.u32 1, %s1063_s9   ;;  %p1290_p12 = scmp.ge.s32.totalorder %s1075_s12, 2 }
 0x113   : > { %s559_s7 = scalar_lea.sflag [#allocation4], %s558_s6 }
 0x114   : > { %p901_p13 = pnand %p1290_p12, %p1132_p6 }
 0x116   : > { %p902_p0 = pneg %p901_p13 }
 0x118   : > { %1058 = dma.done.wait (%p902_p0), %s559_s7, 2048  }
 0x119   : > { %1060 = vsyncadd (%p902_p0), %s559_s7, 4294965248  ;;  %p16_p5 = scmp.ge.s32.totalorder %s1150_s23, 4   ;;  %s1291_s9 = smov %s1067_s10 }
 0x11a   : > { %s1292_s10 = smov %s1071_s11  ;;  %s1293_s11 = smov %s1162_s28 }
 0x11b   : > { %s1294_s12 = smov %s1150_s23  ;;  %18 = sbr.rel (!%p16_p5) target bundleno = 6 (0x6), region = 77 }
 0x120   :  { %565 = vsyncpa [#allocation3], 1 }
 0x121   :  { %567 = vsyncpa [#allocation3 + $0x1], 1 }
 0x122   :  { %568 = vsyncpa [#allocation6], 1 }
 0x123   :  { %569 = vsyncpa [#allocation4], 1 }
 0x124   :  { %571 = vsyncpa [#allocation4 + $0x1], 1 }

</bundles_post_ra>
